<compile_context>
chip_gen: v6e
topology: v6e:2x2x1
jax: 0.10.0
libtpu: 0.0.40
codegen_flags: <defaults>
</compile_context>

<pallas_src>
import functools

import jax
import jax.numpy as jnp
from jax import lax
from jax.experimental import pallas as pl
from jax.experimental.pallas import tpu as pltpu

HPAD = 128   # hidden width 16 zero-padded to a full lane width
CPAD = 128   # class lanes zero-padded to a full lane width (masked in softmax)


def _round_up(x, m):
    return ((x + m - 1) // m) * m


def _pad2(w, rows, cols):
    w = jnp.asarray(w, jnp.float32)
    return jnp.zeros((rows, cols), jnp.float32).at[:w.shape[0], :w.shape[1]].set(w)


# --------------------------------------------------------------- kernels -----

def project_kernel(x_ref, w1_ref, p_ref):
    # p = x @ W1 (bias added after aggregation -- see reorder note above).
    # bf16 x bf16 -> f32 accumulate on the native MXU path; store bf16.
    p_ref[...] = jnp.dot(x_ref[...], w1_ref[...],
                         preferred_element_type=jnp.float32).astype(p_ref.dtype)


def gin_layer1_kernel(a_ref, p_all_ref, b1_ref, w2_ref, b2_ref, h_ref):
    # (x + A x) W1 + b1  ==  p + A p + b1   with p = x W1   (exact, eps = 0)
    tm = a_ref.shape[0]
    row0 = pl.multiple_of(pl.program_id(0) * tm, tm)
    # Self-term tile sliced from the resident full p block (no second stream);
    # bf16 + f32 promotes to f32.
    agg = p_all_ref[pl.ds(row0, tm), :] + jnp.dot(
        a_ref[...], p_all_ref[...], preferred_element_type=jnp.float32)
    h = jnp.maximum(agg + b1_ref[...], 0.0)
    h = jnp.maximum(
        jnp.dot(h, w2_ref[...], preferred_element_type=jnp.float32)
        + b2_ref[...], 0.0)
    # the outer F.relu is idempotent after the MLP's trailing ReLU
    h_ref[...] = h.astype(h_ref.dtype)


def gin_layer2_kernel(a_ref, h_all_ref, w3_ref, b3_ref, w4_ref, b4_ref,
                      out_ref, *, num_classes):
    tm = a_ref.shape[0]
    row0 = pl.multiple_of(pl.program_id(0) * tm, tm)
    agg = h_all_ref[pl.ds(row0, tm), :] + jnp.dot(
        a_ref[...], h_all_ref[...], preferred_element_type=jnp.float32)
    g = jnp.maximum(
        jnp.dot(agg, w3_ref[...], preferred_element_type=jnp.float32)
        + b3_ref[...], 0.0)
    logits = jnp.dot(g, w4_ref[...],
                     preferred_element_type=jnp.float32) + b4_ref[...]
    # Mask padded class lanes so they cannot perturb max / LSE.
    lane = lax.broadcasted_iota(jnp.int32, (1, logits.shape[1]), 1)
    logits = jnp.where(lane < num_classes, logits, -1e30)
    m = jnp.max(logits, axis=1, keepdims=True)
    s = logits - m
    lse = jnp.log(jnp.sum(jnp.exp(s), axis=1, keepdims=True))
    out_ref[...] = s - lse


# --------------------------------------------------------------- wrapper -----

def build_dense_adjacency(edge_index, num_nodes_padded):
    """A[dst, src] += 1.  Built ONCE per (static) graph, not per forward.

    Invariant relied upon for correctness with padded node rows: edges only
    reference real node indices, so the columns/rows of A belonging to padded
    nodes are all-zero and padded h rows (which become nonzero through the
    bias+ReLU path) can never leak into real rows.
    """
    src, dst = edge_index[0], edge_index[1]
    a = jnp.zeros((num_nodes_padded, num_nodes_padded), jnp.float32)
    a = a.at[dst, src].add(1.0)
    # Small-integer counts are exact in bf16; halves A traffic and lets the
    # aggregation matmul run on the native bf16 MXU path.
    return a.astype(jnp.bfloat16)


def gin_net_cora_forward(x, a, params, *, num_classes, tile_rows=512):
    """x: [Npad, F] f32 (zero-padded rows), a: [Npad, Npad] bf16 adjacency."""
    npad, f = x.shape
    assert a.shape == (npad, npad)
    assert num_classes <= CPAD
    tm = min(tile_rows, npad)
    assert tm % 8 == 0 and npad % tm == 0
    grid = (npad // tm,)
    fpad = _round_up(f, 128)   # lane-align the deep feature contraction

    # 32 MiB is safe everywhere (fits v7x's 64 MiB physical VMEM with
    # headroom); on v6e/v5e it could be raised to ~64 MiB with larger tiles.
    cparams = pltpu.CompilerParams(
        dimension_semantics=("parallel",),
        vmem_limit_bytes=32 * 1024 * 1024,
    )

    # x / W1 in bf16 (Cora features are 0/1 -> exact); feature dim padded.
    xb = jnp.zeros((npad, fpad), jnp.bfloat16).at[:, :f].set(
        x.astype(jnp.bfloat16))
    w1 = _pad2(params["w1"], fpad, HPAD).astype(jnp.bfloat16)
    b1 = _pad2(params["b1"].reshape(1, -1), 1, HPAD)
    w2 = _pad2(params["w2"], HPAD, HPAD)
    b2 = _pad2(params["b2"].reshape(1, -1), 1, HPAD)
    w3 = _pad2(params["w3"], HPAD, HPAD)
    b3 = _pad2(params["b3"].reshape(1, -1), 1, HPAD)
    w4 = _pad2(params["w4"], HPAD, CPAD)
    b4 = _pad2(params["b4"].reshape(1, -1), 1, CPAD)

    def row_spec(cols):            # streamed per-destination-row-tile operand
        return pl.BlockSpec((tm, cols), lambda i: (i, 0))

    def full_spec(rows, cols):     # small operand kept resident across the grid
        return pl.BlockSpec((rows, cols), lambda i: (0, 0))

    # ---- stage 1: p = x @ W1  (projection pushed before aggregation) --------
    p = pl.pallas_call(
        project_kernel,
        grid=grid,
        in_specs=[row_spec(fpad), full_spec(fpad, HPAD)],
        out_specs=row_spec(HPAD),
        out_shape=jax.ShapeDtypeStruct((npad, HPAD), jnp.bfloat16),
        compiler_params=cparams,
        cost_estimate=pl.CostEstimate(
            flops=2 * npad * fpad * HPAD,
            transcendentals=0,
            bytes_accessed=2 * (npad * fpad + fpad * HPAD + npad * HPAD)),
    )(xb, w1)

    # ---- stage 2: GIN layer 1 (bf16 A streamed, bf16 p resident) ------------
    h = pl.pallas_call(
        gin_layer1_kernel,
        grid=grid,
        in_specs=[row_spec(npad),           # A row tile (bf16, streamed)
                  full_spec(npad, HPAD),    # p (all nodes, bf16, resident)
                  full_spec(1, HPAD),       # b1
                  full_spec(HPAD, HPAD),    # W2
                  full_spec(1, HPAD)],      # b2
        out_specs=row_spec(HPAD),
        out_shape=jax.ShapeDtypeStruct((npad, HPAD), jnp.bfloat16),
        compiler_params=cparams,
        cost_estimate=pl.CostEstimate(
            flops=2 * npad * npad * HPAD + 2 * npad * HPAD * HPAD,
            transcendentals=0,
            bytes_accessed=2 * npad * npad
            + 2 * npad * HPAD * 2 + 4 * HPAD * HPAD),
    )(a, p, b1, w2, b2)

    # ---- stage 3: GIN layer 2 + log_softmax ----------------------------------
    out = pl.pallas_call(
        functools.partial(gin_layer2_kernel, num_classes=num_classes),
        grid=grid,
        in_specs=[row_spec(npad),           # A row tile (bf16, streamed)
                  full_spec(npad, HPAD),    # h (all nodes, bf16, resident)
                  full_spec(HPAD, HPAD),    # W3
                  full_spec(1, HPAD),       # b3
                  full_spec(HPAD, CPAD),    # W4
                  full_spec(1, CPAD)],      # b4
        out_specs=row_spec(CPAD),
        out_shape=jax.ShapeDtypeStruct((npad, CPAD), jnp.float32),
        compiler_params=cparams,
        cost_estimate=pl.CostEstimate(
            flops=(2 * npad * npad * HPAD + 2 * npad * HPAD * HPAD
                   + 2 * npad * HPAD * CPAD),
            transcendentals=npad * CPAD,
            bytes_accessed=2 * npad * npad
            + 2 * npad * HPAD + 4 * (HPAD * (HPAD + CPAD) + npad * CPAD)),
    )(a, h, w3, b3, w4, b4)

    return out  # [Npad, CPAD]; caller slices [:N, :num_classes]


# --------------------------------------------------------------- reference ---

def reference_forward(x, edge_index, params):
    """Pure-JAX reference in the original op order (for numerical checking)."""
    n = x.shape[0]
    src, dst = edge_index[0], edge_index[1]
    a = jnp.zeros((n, n), jnp.float32).at[dst, src].add(1.0)
    agg1 = x + a @ x
    h = jnp.maximum(agg1 @ params["w1"] + params["b1"], 0.0)
    h = jnp.maximum(h @ params["w2"] + params["b2"], 0.0)
    h = jnp.maximum(h, 0.0)
    agg2 = h + a @ h
    g = jnp.maximum(agg2 @ params["w3"] + params["b3"], 0.0)
    logits = g @ params["w4"] + params["b4"]
    return jax.nn.log_softmax(logits, axis=1)


def init_params(key, num_features, num_classes, hidden=16):
    """Deterministic synthetic parameters. Weights stored as [in, out]."""
    ks = jax.random.split(key, 8)

    def lin(kw, kb, fan_in, fan_out):
        lim = 1.0 / jnp.sqrt(fan_in)
        w = jax.random.uniform(kw, (fan_in, fan_out), jnp.float32, -lim, lim)
        b = jax.random.uniform(kb, (fan_out,), jnp.float32, -lim, lim)
        return w, b

    w1, b1 = lin(ks[0], ks[1], num_features, hidden)
    w2, b2 = lin(ks[2], ks[3], hidden, hidden)
    w3, b3 = lin(ks[4], ks[5], hidden, hidden)
    w4, b4 = lin(ks[6], ks[7], hidden, num_classes)
    return dict(w1=w1, b1=b1, w2=w2, b2=b2, w3=w3, b3=b3, w4=w4, b4=b4)


if __name__ == "__main__":
    key = jax.random.PRNGKey(0)
    k_x, k_p, k_e = jax.random.split(key, 3)

    num_nodes = 32
    num_features = 32
    num_classes = 8
    tile_rows = 16      # small tile so the demo exercises a multi-step grid

    # Cora-style binary (0/1) bag-of-words node features (exact in bf16).
    x = (jax.random.uniform(k_x, (num_nodes, num_features)) < 0.3).astype(
        jnp.float32)

    # Deterministic small graph: bidirectional ring + a few extra edges.
    ring_src = jnp.arange(num_nodes, dtype=jnp.int32)
    ring_dst = (ring_src + 1) % num_nodes
    extra_src = jax.random.randint(k_e, (8,), 0, num_nodes, jnp.int32)
    extra_dst = (extra_src + 5) % num_nodes
    src = jnp.concatenate([ring_src, ring_dst, extra_src])
    dst = jnp.concatenate([ring_dst, ring_src, extra_dst])
    edge_index = jnp.stack([src, dst], axis=0)  # [2, E]

    params = init_params(k_p, num_features, num_classes)

    # Static per-graph preprocessing (hoisted out of the forward pass).
    tm = min(tile_rows, _round_up(num_nodes, 8))
    npad = _round_up(num_nodes, tm)
    x_pad = jnp.zeros((npad, num_features), jnp.float32).at[:num_nodes].set(x)
    a = build_dense_adjacency(edge_index, npad)

    fwd = jax.jit(functools.partial(gin_net_cora_forward,
                                    num_classes=num_classes, tile_rows=tm))
    out_pad = jax.block_until_ready(fwd(x_pad, a, params))
    out = out_pad[:num_nodes, :num_classes]

    assert out.shape == (num_nodes, num_classes)
    # log_softmax rows should sum (in prob space) to 1.
    assert jnp.allclose(jnp.sum(jnp.exp(out), axis=1), 1.0, atol=1e-3)

    # Cross-check against the pure-JAX f32 reference (original op order).
    # Tolerance loosened slightly vs the all-f32 kernel: p/h/W1 are bf16 now.
    with jax.default_matmul_precision("highest"):
        ref = reference_forward(x, edge_index, params)
    assert jnp.allclose(out, ref, atol=5e-2, rtol=5e-2)

    print("KERNEL_OK")
</pallas_src>

<mosaic_0001>
module attributes {stable_mosaic.version = 11 : i64} {
  func.func @gin_layer2_kernel(%arg0: i32, %arg1: memref<16x32xbf16, #tpu.memory_space<vmem>>, %arg2: memref<32x128xbf16, #tpu.memory_space<vmem>>, %arg3: memref<128x128xf32, #tpu.memory_space<vmem>>, %arg4: memref<1x128xf32, #tpu.memory_space<vmem>>, %arg5: memref<128x128xf32, #tpu.memory_space<vmem>>, %arg6: memref<1x128xf32, #tpu.memory_space<vmem>>, %arg7: memref<16x128xf32, #tpu.memory_space<vmem>>) attributes {dimension_semantics = [#tpu.dimension_semantics<parallel>], iteration_bounds = array<i64: 2>, scalar_prefetch = 0 : i64, scratch_operands = 0 : i64, tpu.core_type = #tpu.core_type<tc>, window_params = [{transform_indices = @transform_0, window_bounds = array<i64: 16, 32>}, {pipeline_mode = #tpu.pipeline_mode<synchronous>, transform_indices = @transform_1, window_bounds = array<i64: 32, 128>}, {pipeline_mode = #tpu.pipeline_mode<synchronous>, transform_indices = @transform_2, window_bounds = array<i64: 128, 128>}, {pipeline_mode = #tpu.pipeline_mode<synchronous>, transform_indices = @transform_3, window_bounds = array<i64: 1, 128>}, {pipeline_mode = #tpu.pipeline_mode<synchronous>, transform_indices = @transform_4, window_bounds = array<i64: 128, 128>}, {pipeline_mode = #tpu.pipeline_mode<synchronous>, transform_indices = @transform_5, window_bounds = array<i64: 1, 128>}, {transform_indices = @transform_6, window_bounds = array<i64: 16, 128>}]} {
    %c16_i32 = arith.constant 16 : i32
    %0 = arith.muli %arg0, %c16_i32 : i32
    %1 = tpu.assume_multiple %0, 16 : i32
    %2 = arith.index_cast %1 : i32 to index
    %c0 = arith.constant 0 : index
    %3 = vector.load %arg2[%2, %c0] : memref<32x128xbf16, #tpu.memory_space<vmem>>, vector<16x128xbf16>
    %c0_0 = arith.constant 0 : index
    %c0_1 = arith.constant 0 : index
    %4 = vector.load %arg1[%c0_0, %c0_1] : memref<16x32xbf16, #tpu.memory_space<vmem>>, vector<16x32xbf16>
    %c0_2 = arith.constant 0 : index
    %c0_3 = arith.constant 0 : index
    %5 = vector.load %arg2[%c0_2, %c0_3] : memref<32x128xbf16, #tpu.memory_space<vmem>>, vector<32x128xbf16>
    %cst = arith.constant dense<0.000000e+00> : vector<16x128xf32>
    %6 = tpu.matmul %4, %5, %cst {dimension_numbers = #tpu.dot_dimension_numbers<[1], [0], [0], [1], [0, 0, 1, 1], [], []>} : vector<16x32xbf16>, vector<32x128xbf16>, vector<16x128xf32> -> vector<16x128xf32>
    %7 = arith.extf %3 : vector<16x128xbf16> to vector<16x128xf32>
    %8 = arith.addf %7, %6 : vector<16x128xf32>
    %c0_4 = arith.constant 0 : index
    %c0_5 = arith.constant 0 : index
    %9 = vector.load %arg3[%c0_4, %c0_5] : memref<128x128xf32, #tpu.memory_space<vmem>>, vector<128x128xf32>
    %cst_6 = arith.constant dense<0.000000e+00> : vector<16x128xf32>
    %10 = tpu.matmul %8, %9, %cst_6 {dimension_numbers = #tpu.dot_dimension_numbers<[1], [0], [0], [1], [0, 0, 1, 1], [], []>} : vector<16x128xf32>, vector<128x128xf32>, vector<16x128xf32> -> vector<16x128xf32>
    %c0_7 = arith.constant 0 : index
    %c0_8 = arith.constant 0 : index
    %11 = vector.load %arg4[%c0_7, %c0_8] : memref<1x128xf32, #tpu.memory_space<vmem>>, vector<1x128xf32>
    %12 = vector.broadcast %11 : vector<1x128xf32> to vector<16x128xf32>
    %13 = arith.addf %10, %12 : vector<16x128xf32>
    %cst_9 = arith.constant 0.000000e+00 : f32
    %14 = vector.broadcast %cst_9 : f32 to vector<16x128xf32>
    %15 = arith.maximumf %13, %14 : vector<16x128xf32>
    %c0_10 = arith.constant 0 : index
    %c0_11 = arith.constant 0 : index
    %16 = vector.load %arg5[%c0_10, %c0_11] : memref<128x128xf32, #tpu.memory_space<vmem>>, vector<128x128xf32>
    %cst_12 = arith.constant dense<0.000000e+00> : vector<16x128xf32>
    %17 = tpu.matmul %15, %16, %cst_12 {dimension_numbers = #tpu.dot_dimension_numbers<[1], [0], [0], [1], [0, 0, 1, 1], [], []>} : vector<16x128xf32>, vector<128x128xf32>, vector<16x128xf32> -> vector<16x128xf32>
    %c0_13 = arith.constant 0 : index
    %c0_14 = arith.constant 0 : index
    %18 = vector.load %arg6[%c0_13, %c0_14] : memref<1x128xf32, #tpu.memory_space<vmem>>, vector<1x128xf32>
    %19 = vector.broadcast %18 : vector<1x128xf32> to vector<16x128xf32>
    %20 = arith.addf %17, %19 : vector<16x128xf32>
    %21 = tpu.iota {dimensions = array<i32: 1>} : vector<1x128xi32>
    %c8_i32 = arith.constant 8 : i32
    %22 = vector.broadcast %c8_i32 : i32 to vector<1x128xi32>
    %23 = arith.cmpi slt, %21, %22 : vector<1x128xi32>
    %cst_15 = arith.constant -1.000000e+30 : f32
    %24 = vector.shape_cast %23 : vector<1x128xi1> to vector<1x128xi1>
    %25 = vector.broadcast %24 : vector<1x128xi1> to vector<16x128xi1>
    %26 = vector.broadcast %cst_15 : f32 to vector<16x128xf32>
    %27 = arith.select %25, %20, %26 : vector<16x128xi1>, vector<16x128xf32>
    %cst_16 = arith.constant dense<0xFF800000> : vector<16xf32>
    %28 = vector.multi_reduction <maximumf>, %27, %cst_16 [1] : vector<16x128xf32> to vector<16xf32>
    %29 = vector.shape_cast %28 : vector<16xf32> to vector<16x1xf32>
    %30 = vector.broadcast %29 : vector<16x1xf32> to vector<16x128xf32>
    %31 = arith.subf %27, %30 : vector<16x128xf32>
    %32 = math.exp %31 : vector<16x128xf32>
    %cst_17 = arith.constant dense<0.000000e+00> : vector<16xf32>
    %33 = vector.multi_reduction <add>, %32, %cst_17 [1] : vector<16x128xf32> to vector<16xf32>
    %34 = vector.shape_cast %33 : vector<16xf32> to vector<16x1xf32>
    %35 = math.log %34 : vector<16x1xf32>
    %36 = vector.broadcast %35 : vector<16x1xf32> to vector<16x128xf32>
    %37 = arith.subf %31, %36 : vector<16x128xf32>
    %c0_18 = arith.constant 0 : index
    %c0_19 = arith.constant 0 : index
    %38 = vector.load %arg7[%c0_18, %c0_19] : memref<16x128xf32, #tpu.memory_space<vmem>>, vector<16x128xf32>
    tpu.vector_store %arg7[%c0_18, %c0_19], %37 {strides = array<i32>} : memref<16x128xf32, #tpu.memory_space<vmem>>, vector<16x128xf32>,
    return
  }
  func.func @transform_0(%arg0: i32) -> (i32, i32) {
    %c0_i32 = arith.constant 0 : i32
    %c0_i32_0 = arith.constant 0 : i32
    return %arg0, %c0_i32 : i32, i32
  }
  func.func @transform_1(%arg0: i32) -> (i32, i32) {
    %c0_i32 = arith.constant 0 : i32
    %c0_i32_0 = arith.constant 0 : i32
    %c0_i32_1 = arith.constant 0 : i32
    return %c0_i32, %c0_i32_0 : i32, i32
  }
  func.func @transform_2(%arg0: i32) -> (i32, i32) {
    %c0_i32 = arith.constant 0 : i32
    %c0_i32_0 = arith.constant 0 : i32
    %c0_i32_1 = arith.constant 0 : i32
    return %c0_i32, %c0_i32_0 : i32, i32
  }
  func.func @transform_3(%arg0: i32) -> (i32, i32) {
    %c0_i32 = arith.constant 0 : i32
    %c0_i32_0 = arith.constant 0 : i32
    %c0_i32_1 = arith.constant 0 : i32
    return %c0_i32, %c0_i32_0 : i32, i32
  }
  func.func @transform_4(%arg0: i32) -> (i32, i32) {
    %c0_i32 = arith.constant 0 : i32
    %c0_i32_0 = arith.constant 0 : i32
    %c0_i32_1 = arith.constant 0 : i32
    return %c0_i32, %c0_i32_0 : i32, i32
  }
  func.func @transform_5(%arg0: i32) -> (i32, i32) {
    %c0_i32 = arith.constant 0 : i32
    %c0_i32_0 = arith.constant 0 : i32
    %c0_i32_1 = arith.constant 0 : i32
    return %c0_i32, %c0_i32_0 : i32, i32
  }
  func.func @transform_6(%arg0: i32) -> (i32, i32) {
    %c0_i32 = arith.constant 0 : i32
    %c0_i32_0 = arith.constant 0 : i32
    return %arg0, %c0_i32 : i32, i32
  }
}

module attributes {stable_mosaic.version = 11 : i64} {
  func.func @project_kernel(%arg0: i32, %arg1: memref<16x128xbf16, #tpu.memory_space<vmem>>, %arg2: memref<128x128xbf16, #tpu.memory_space<vmem>>, %arg3: memref<16x128xbf16, #tpu.memory_space<vmem>>) attributes {dimension_semantics = [#tpu.dimension_semantics<parallel>], iteration_bounds = array<i64: 2>, scalar_prefetch = 0 : i64, scratch_operands = 0 : i64, tpu.core_type = #tpu.core_type<tc>, window_params = [{transform_indices = @transform_0, window_bounds = array<i64: 16, 128>}, {pipeline_mode = #tpu.pipeline_mode<synchronous>, transform_indices = @transform_1, window_bounds = array<i64: 128, 128>}, {transform_indices = @transform_2, window_bounds = array<i64: 16, 128>}]} {
    %c0 = arith.constant 0 : index
    %c0_0 = arith.constant 0 : index
    %0 = vector.load %arg1[%c0, %c0_0] : memref<16x128xbf16, #tpu.memory_space<vmem>>, vector<16x128xbf16>
    %c0_1 = arith.constant 0 : index
    %c0_2 = arith.constant 0 : index
    %1 = vector.load %arg2[%c0_1, %c0_2] : memref<128x128xbf16, #tpu.memory_space<vmem>>, vector<128x128xbf16>
    %cst = arith.constant dense<0.000000e+00> : vector<16x128xf32>
    %2 = tpu.matmul %0, %1, %cst {dimension_numbers = #tpu.dot_dimension_numbers<[1], [0], [0], [1], [0, 0, 1, 1], [], []>} : vector<16x128xbf16>, vector<128x128xbf16>, vector<16x128xf32> -> vector<16x128xf32>
    %3 = arith.truncf %2 : vector<16x128xf32> to vector<16x128xbf16>
    %c0_3 = arith.constant 0 : index
    %c0_4 = arith.constant 0 : index
    %4 = vector.load %arg3[%c0_3, %c0_4] : memref<16x128xbf16, #tpu.memory_space<vmem>>, vector<16x128xbf16>
    tpu.vector_store %arg3[%c0_3, %c0_4], %3 {strides = array<i32>} : memref<16x128xbf16, #tpu.memory_space<vmem>>, vector<16x128xbf16>,
    return
  }
  func.func @transform_0(%arg0: i32) -> (i32, i32) {
    %c0_i32 = arith.constant 0 : i32
    %c0_i32_0 = arith.constant 0 : i32
    return %arg0, %c0_i32 : i32, i32
  }
  func.func @transform_1(%arg0: i32) -> (i32, i32) {
    %c0_i32 = arith.constant 0 : i32
    %c0_i32_0 = arith.constant 0 : i32
    %c0_i32_1 = arith.constant 0 : i32
    return %c0_i32, %c0_i32_0 : i32, i32
  }
  func.func @transform_2(%arg0: i32) -> (i32, i32) {
    %c0_i32 = arith.constant 0 : i32
    %c0_i32_0 = arith.constant 0 : i32
    return %arg0, %c0_i32 : i32, i32
  }
}

module attributes {stable_mosaic.version = 11 : i64} {
  func.func @gin_layer1_kernel(%arg0: i32, %arg1: memref<16x32xbf16, #tpu.memory_space<vmem>>, %arg2: memref<32x128xbf16, #tpu.memory_space<vmem>>, %arg3: memref<1x128xf32, #tpu.memory_space<vmem>>, %arg4: memref<128x128xf32, #tpu.memory_space<vmem>>, %arg5: memref<1x128xf32, #tpu.memory_space<vmem>>, %arg6: memref<16x128xbf16, #tpu.memory_space<vmem>>) attributes {dimension_semantics = [#tpu.dimension_semantics<parallel>], iteration_bounds = array<i64: 2>, scalar_prefetch = 0 : i64, scratch_operands = 0 : i64, tpu.core_type = #tpu.core_type<tc>, window_params = [{transform_indices = @transform_0, window_bounds = array<i64: 16, 32>}, {pipeline_mode = #tpu.pipeline_mode<synchronous>, transform_indices = @transform_1, window_bounds = array<i64: 32, 128>}, {pipeline_mode = #tpu.pipeline_mode<synchronous>, transform_indices = @transform_2, window_bounds = array<i64: 1, 128>}, {pipeline_mode = #tpu.pipeline_mode<synchronous>, transform_indices = @transform_3, window_bounds = array<i64: 128, 128>}, {pipeline_mode = #tpu.pipeline_mode<synchronous>, transform_indices = @transform_4, window_bounds = array<i64: 1, 128>}, {transform_indices = @transform_5, window_bounds = array<i64: 16, 128>}]} {
    %c16_i32 = arith.constant 16 : i32
    %0 = arith.muli %arg0, %c16_i32 : i32
    %1 = tpu.assume_multiple %0, 16 : i32
    %2 = arith.index_cast %1 : i32 to index
    %c0 = arith.constant 0 : index
    %3 = vector.load %arg2[%2, %c0] : memref<32x128xbf16, #tpu.memory_space<vmem>>, vector<16x128xbf16>
    %c0_0 = arith.constant 0 : index
    %c0_1 = arith.constant 0 : index
    %4 = vector.load %arg1[%c0_0, %c0_1] : memref<16x32xbf16, #tpu.memory_space<vmem>>, vector<16x32xbf16>
    %c0_2 = arith.constant 0 : index
    %c0_3 = arith.constant 0 : index
    %5 = vector.load %arg2[%c0_2, %c0_3] : memref<32x128xbf16, #tpu.memory_space<vmem>>, vector<32x128xbf16>
    %cst = arith.constant dense<0.000000e+00> : vector<16x128xf32>
    %6 = tpu.matmul %4, %5, %cst {dimension_numbers = #tpu.dot_dimension_numbers<[1], [0], [0], [1], [0, 0, 1, 1], [], []>} : vector<16x32xbf16>, vector<32x128xbf16>, vector<16x128xf32> -> vector<16x128xf32>
    %7 = arith.extf %3 : vector<16x128xbf16> to vector<16x128xf32>
    %8 = arith.addf %7, %6 : vector<16x128xf32>
    %c0_4 = arith.constant 0 : index
    %c0_5 = arith.constant 0 : index
    %9 = vector.load %arg3[%c0_4, %c0_5] : memref<1x128xf32, #tpu.memory_space<vmem>>, vector<1x128xf32>
    %10 = vector.broadcast %9 : vector<1x128xf32> to vector<16x128xf32>
    %11 = arith.addf %8, %10 : vector<16x128xf32>
    %cst_6 = arith.constant 0.000000e+00 : f32
    %12 = vector.broadcast %cst_6 : f32 to vector<16x128xf32>
    %13 = arith.maximumf %11, %12 : vector<16x128xf32>
    %c0_7 = arith.constant 0 : index
    %c0_8 = arith.constant 0 : index
    %14 = vector.load %arg4[%c0_7, %c0_8] : memref<128x128xf32, #tpu.memory_space<vmem>>, vector<128x128xf32>
    %cst_9 = arith.constant dense<0.000000e+00> : vector<16x128xf32>
    %15 = tpu.matmul %13, %14, %cst_9 {dimension_numbers = #tpu.dot_dimension_numbers<[1], [0], [0], [1], [0, 0, 1, 1], [], []>} : vector<16x128xf32>, vector<128x128xf32>, vector<16x128xf32> -> vector<16x128xf32>
    %c0_10 = arith.constant 0 : index
    %c0_11 = arith.constant 0 : index
    %16 = vector.load %arg5[%c0_10, %c0_11] : memref<1x128xf32, #tpu.memory_space<vmem>>, vector<1x128xf32>
    %17 = vector.broadcast %16 : vector<1x128xf32> to vector<16x128xf32>
    %18 = arith.addf %15, %17 : vector<16x128xf32>
    %cst_12 = arith.constant 0.000000e+00 : f32
    %19 = vector.broadcast %cst_12 : f32 to vector<16x128xf32>
    %20 = arith.maximumf %18, %19 : vector<16x128xf32>
    %21 = arith.truncf %20 : vector<16x128xf32> to vector<16x128xbf16>
    %c0_13 = arith.constant 0 : index
    %c0_14 = arith.constant 0 : index
    %22 = vector.load %arg6[%c0_13, %c0_14] : memref<16x128xbf16, #tpu.memory_space<vmem>>, vector<16x128xbf16>
    tpu.vector_store %arg6[%c0_13, %c0_14], %21 {strides = array<i32>} : memref<16x128xbf16, #tpu.memory_space<vmem>>, vector<16x128xbf16>,
    return
  }
  func.func @transform_0(%arg0: i32) -> (i32, i32) {
    %c0_i32 = arith.constant 0 : i32
    %c0_i32_0 = arith.constant 0 : i32
    return %arg0, %c0_i32 : i32, i32
  }
  func.func @transform_1(%arg0: i32) -> (i32, i32) {
    %c0_i32 = arith.constant 0 : i32
    %c0_i32_0 = arith.constant 0 : i32
    %c0_i32_1 = arith.constant 0 : i32
    return %c0_i32, %c0_i32_0 : i32, i32
  }
  func.func @transform_2(%arg0: i32) -> (i32, i32) {
    %c0_i32 = arith.constant 0 : i32
    %c0_i32_0 = arith.constant 0 : i32
    %c0_i32_1 = arith.constant 0 : i32
    return %c0_i32, %c0_i32_0 : i32, i32
  }
  func.func @transform_3(%arg0: i32) -> (i32, i32) {
    %c0_i32 = arith.constant 0 : i32
    %c0_i32_0 = arith.constant 0 : i32
    %c0_i32_1 = arith.constant 0 : i32
    return %c0_i32, %c0_i32_0 : i32, i32
  }
  func.func @transform_4(%arg0: i32) -> (i32, i32) {
    %c0_i32 = arith.constant 0 : i32
    %c0_i32_0 = arith.constant 0 : i32
    %c0_i32_1 = arith.constant 0 : i32
    return %c0_i32, %c0_i32_0 : i32, i32
  }
  func.func @transform_5(%arg0: i32) -> (i32, i32) {
    %c0_i32 = arith.constant 0 : i32
    %c0_i32_0 = arith.constant 0 : i32
    return %arg0, %c0_i32 : i32, i32
  }
}

</mosaic_0001>

<bundles_post_ra>
// kernel: gin_net_cora_forward.3
= control target key start
LH: loop header
LB: loop body
LE: loop exit
PB: predicated region body
PF: predicated region fallthrough
CT: control target
= control target key end

     0   :  { %s429_s9 = smov 0   ;;  %s470_s0 = inlined_call_operand.vmem [shape: bf16[32,128], index: 0, kind: input, shape index: {}]   ;;  %s471_s1 = inlined_call_operand.vmem [shape: bf16[128,128], index: 1, kind: input, shape index: {}]   ;;  %s472_s2 = inlined_call_operand.vmem [shape: bf16[32,128], index: 2, kind: output, shape index: {}]  }
   0x1 LB: > { %s327_s10 = sadd.s32 4294967295, %s410_s9   ;;  %p331_p0 = scmp.ge.s32.totalorder %s410_s9, 1  ;;  %s410_s9 = sphi %s429_s9, %s12_s9  }
   0x2   : > { %p113_p1 = scmp.lt.s32.totalorder %s410_s9, 3 }
   0x4   : > { %p114_p2 = pnand %p331_p0, %p113_p1 }
   0x5   : > { %s332_s15 = sshll.u32 (!%p114_p2), %s327_s10, 1 }
   0x6   : > { %117 = sbr.rel (%p114_p2) target bundleno = 244 (0xf4), region = 28  ;;  %p136_p3 = scmp.lt.s32.totalorder (!%p114_p2), %s332_s15, 3 }
   0xb   : > { %v395_v0 = vld [vmem:[%s471_s1 + $0x38] sm:$0xff]   ;;  %v412_v1 = vmov 0.0   ;;  %v396_v2 = vld [vmem:[%s471_s1 + $0x30] sm:$0xff]   ;;  %vm413_vm0 = vmmov 0   ;;  %s474_s15 = smov (!%p136_p3, %s332_s15), 3  ;;  %v397_v3 = vld [vmem:[%s471_s1 + $0x28] sm:$0xff]  }
   0xc   : > { %365 = vmatprep.subr.bf16.mxu0 %v412_v1  ;;  %381 = vmatprep.mubr.msk.bf16.mxu0 %vm413_vm0, %v412_v1  ;;  %s333_s18 = sshll.u32 %s474_s15, 2  ;;  %v398_v4 = vld [vmem:[%s471_s1 + $0x20] sm:$0xff]   ;;  %v399_v5 = vld [vmem:[%s471_s1 + $0x18] sm:$0xff]   ;;  %v400_v6 = vld [vmem:[%s471_s1 + $0x10] sm:$0xff]  }
   0xd   : > { %366 = vmatpush3.bf16.msra.mxu0 %v395_v0  ;;  %s139_s21 = scalar_lea.vmem %s470_s0, %s333_s18  ;;  %v401_v7 = vld [vmem:[%s471_s1 + $0x8] sm:$0xff]   ;;  %v402_v8 = vld [vmem:[%s471_s1] sm:$0xff]   ;;  %s145_s6 = scalar_lea.vmem %s472_s2, %s333_s18 }
   0xe   : > { %367 = vmatprep.subr.bf16.mxu0 %v412_v1  ;;  %v403_v9 = vld [vmem:[%s139_s21] sm:$0xff]  }
  0x11   : > { %368 = vmatpush3.bf16.msra.mxu0 %v396_v2 }
  0x12   : > { %369 = vmatprep.subr.bf16.mxu0 %v412_v1 }
  0x15   : > { %370 = vmatpush3.bf16.msra.mxu0 %v397_v3 }
  0x16   : > { %371 = vmatprep.subr.bf16.mxu0 %v412_v1 }
  0x19   : > { %372 = vmatpush3.bf16.msra.mxu0 %v398_v4 }
  0x1a   : > { %373 = vmatprep.subr.bf16.mxu0 %v412_v1 }
  0x1d   : > { %374 = vmatpush3.bf16.msra.mxu0 %v399_v5 }
  0x1e   : > { %375 = vmatprep.subr.bf16.mxu0 %v412_v1 }
  0x21   : > { %376 = vmatpush3.bf16.msra.mxu0 %v400_v6 }
  0x22   : > { %377 = vmatprep.subr.bf16.mxu0 %v412_v1 }
  0x25   : > { %378 = vmatpush3.bf16.msra.mxu0 %v401_v7 }
  0x26   : > { %379 = vmatprep.subr.bf16.mxu0 %v412_v1 }
  0x29   : > { %380 = vmatpush3.bf16.msra.mxu0 %v402_v8 }
  0x2c   : > { %382 = vmatmul.mubr.bf16.vlgmr.msra.gmra.mxu0 %v403_v9 }
  0xec   : > { %v254_v10 = vpop.f32.mrf.mxu0 }
  0xee   : > { %v383_v11 = vpop.f32.mrf.mxu0 }
  0xf0   : > { %v257_v12 = vpop.f32.mrf.mxu0 }
  0xf1   : > { %v354_v13 = vpack.c.bf16 %v257_v12, %v254_v10 }
  0xf2   : > { %v384_v14 = vpop.f32.mrf.mxu0 }
  0xf3   : > { %355 = vst [vmem:[%s145_s6] sm:$0xff] %v354_v13  }
  0xf4 PF: > { %s12_s9 = sadd.s32 1, %s410_s9  }
  0xf5   : > { %p9_p4 = scmp.ge.s32.totalorder %s12_s9, 4  }
  0xf7   :  { %11 = sbr.rel (!%p9_p4) target bundleno = 1 (0x1), region = 58 }

// kernel: gin_net_cora_forward.4
= control target key start
LH: loop header
LB: loop body
LE: loop exit
PB: predicated region body
PF: predicated region fallthrough
CT: control target
= control target key end

     0   :  { %s636_s18 = smov 0   ;;  %s727_s0 = inlined_call_operand.vmem [shape: bf16[32,32], index: 0, kind: input, shape index: {}]   ;;  %s728_s1 = inlined_call_operand.vmem [shape: bf16[32,128], index: 1, kind: input, shape index: {}]   ;;  %s729_s2 = inlined_call_operand.vmem [shape: f32[1,128], index: 2, kind: input, shape index: {}]   ;;  %s730_s3 = inlined_call_operand.vmem [shape: f32[128,128], index: 3, kind: input, shape index: {}]   ;;  %s731_s4 = inlined_call_operand.vmem [shape: f32[1,128], index: 4, kind: input, shape index: {}]   ;;  %s732_s5 = inlined_call_operand.vmem [shape: bf16[32,128], index: 5, kind: output, shape index: {}]  }
   0x1 LB: > { %s487_s19 = sadd.s32 4294967295, %s602_s18   ;;  %p491_p0 = scmp.ge.s32.totalorder %s602_s18, 1  ;;  %s602_s18 = sphi %s636_s18, %s15_s18  }
   0x2   : > { %p188_p1 = scmp.lt.s32.totalorder %s602_s18, 3 }
   0x4   : > { %p189_p2 = pnand %p491_p0, %p188_p1 }
   0x5   : > { %s492_s24 = sshll.u32 (!%p189_p2), %s487_s19, 1  ;;  %s496_s15 = sshll.u32 (!%p189_p2), %s487_s19, 4 }
   0x6   : > { %192 = sbr.rel (%p189_p2) target bundleno = 425 (0x1a9), region = 40  ;;  %p217_p3 = scmp.lt.s32.totalorder (!%p189_p2), %s492_s24, 3 }
   0x7   : > { %s230_s16 = sshra.s32 (!%p189_p2), %s496_s15, 3 }
   0x8   : > { %s497_s17 = sshll.u32 (!%p189_p2), %s230_s16, 2 }
   0x9   : > { %s233_s22 = scalar_lea.vmem (!%p189_p2), %s728_s1, %s497_s17 }
   0xb   : > { %v593_v0 = vld [vmem:[%s728_s1 + $0x8] sm:$0xff]   ;;  %v604_v1 = vmov 0.0   ;;  %v594_v2 = vld [vmem:[%s728_s1] sm:$0xff]   ;;  %vm605_vm0 = vmmov 0   ;;  %v334_v3 = vld [vmem:[%s730_s3 + $0x78] sm:$0xff]  ;;  %s734_s24 = smov (!%p217_p3, %s492_s24), 3 }
   0xc   : > { %540 = vmatprep.subr.bf16.mxu0 %v604_v1  ;;  %544 = vmatprep.mubr.msk.bf16.mxu0 %vm605_vm0, %v604_v1  ;;  %v333_v4 = vld [vmem:[%s730_s3 + $0x70] sm:$0xff]  ;;  %v332_v5 = vld [vmem:[%s730_s3 + $0x68] sm:$0xff]  ;;  %v331_v6 = vld [vmem:[%s730_s3 + $0x60] sm:$0xff]  ;;  %s493_s8 = sshll.u32 %s734_s24, 2  ;;  %vm259_vm1 = vcmask 261120  }
   0xd   : > { %541 = vmatpush3.bf16.msra.mxu0 %v593_v0  ;;  %548 = vmatprep.subr.mxu1 %v334_v3  ;;  %s220_s11 = scalar_lea.vmem %s727_s0, %s493_s8  ;;  %v330_v7 = vld [vmem:[%s730_s3 + $0x58] sm:$0xff]  ;;  %v329_v9 = vld [vmem:[%s730_s3 + $0x50] sm:$0xff]  ;;  %v328_v10 = vld [vmem:[%s730_s3 + $0x48] sm:$0xff]  ;;  %s226_s29 = scalar_lea.vmem %s732_s5, %s493_s8 }
   0xe   : > { %542 = vmatprep.subr.bf16.mxu0 %v604_v1  ;;  %549 = vmatpush3.msra.mxu1 %v334_v3  ;;  %v595_v8 = vld [vmem:[%s220_s11] sm:$0xff]   ;;  %v326_v12 = vld [vmem:[%s730_s3 + $0x38] sm:$0xff]  ;;  %v325_v13 = vld [vmem:[%s730_s3 + $0x30] sm:$0xff] }
   0xf   : > { %550 = vmatprep.subr.mxu1 %v333_v4  ;;  %v327_v11 = vld [vmem:[%s730_s3 + $0x40] sm:$0xff]  ;;  %v324_v14 = vld [vmem:[%s730_s3 + $0x28] sm:$0xff]  ;;  %v322_v16 = vld [vmem:[%s730_s3 + $0x18] sm:$0xff] }
  0x10   : > { %551 = vmatpush3.msra.mxu1 %v333_v4  ;;  %v323_v15 = vld [vmem:[%s730_s3 + $0x20] sm:$0xff]  ;;  %v321_v17 = vld [vmem:[%s730_s3 + $0x10] sm:$0xff]  ;;  %v320_v18 = vld [vmem:[%s730_s3 + $0x8] sm:$0xff] }
  0x11   : > { %543 = vmatpush3.bf16.msra.mxu0 %v594_v2  ;;  %552 = vmatprep.subr.mxu1 %v332_v5  ;;  %v319_v19 = vld [vmem:[%s730_s3] sm:$0xff] }
  0x12   : > { %553 = vmatpush3.msra.mxu1 %v332_v5  ;;  %v511_v20 = vld [vmem:[%s233_s22] sm:$0xff]  }
  0x13   : > { %554 = vmatprep.subr.mxu1 %v331_v6  ;;  %v512_v21 = vunpack.c.l.bf16 %v511_v20  ;;  %v502_v23 = vld [vmem:[%s729_s2] ss:$0 sm:$0xff]  ;;  %v513_v25 = vunpack.c.h.bf16 %v511_v20 }
  0x14   : > { %555 = vmatpush3.msra.mxu1 %v331_v6  ;;  %545 = vmatmul.mubr.msk.bf16.vlgmr.msra.gmra.mxu0 %vm259_vm1, %v595_v8  ;;  %v503_v34 = vld [vmem:[%s731_s4] ss:$0 sm:$0xff] }
  0x15   : > { %556 = vmatprep.subr.mxu1 %v330_v7 }
  0x16   : > { %557 = vmatpush3.msra.mxu1 %v330_v7 }
  0x17   : > { %558 = vmatprep.subr.mxu1 %v329_v9 }
  0x18   : > { %559 = vmatpush3.msra.mxu1 %v329_v9 }
  0x19   : > { %560 = vmatprep.subr.mxu1 %v328_v10 }
  0x1a   : > { %561 = vmatpush3.msra.mxu1 %v328_v10 }
  0x1b   : > { %562 = vmatprep.subr.mxu1 %v327_v11 }
  0x1c   : > { %563 = vmatpush3.msra.mxu1 %v327_v11 }
  0x1d   : > { %564 = vmatprep.subr.mxu1 %v326_v12 }
  0x1e   : > { %565 = vmatpush3.msra.mxu1 %v326_v12 }
  0x1f   : > { %566 = vmatprep.subr.mxu1 %v325_v13 }
  0x20   : > { %567 = vmatpush3.msra.mxu1 %v325_v13 }
  0x21   : > { %568 = vmatprep.subr.mxu1 %v324_v14 }
  0x22   : > { %569 = vmatpush3.msra.mxu1 %v324_v14 }
  0x23   : > { %570 = vmatprep.subr.mxu1 %v323_v15 }
  0x24   : > { %571 = vmatpush3.msra.mxu1 %v323_v15 }
  0x25   : > { %572 = vmatprep.subr.mxu1 %v322_v16 }
  0x26   : > { %573 = vmatpush3.msra.mxu1 %v322_v16 }
  0x27   : > { %574 = vmatprep.subr.mxu1 %v321_v17 }
  0x28   : > { %575 = vmatpush3.msra.mxu1 %v321_v17 }
  0x29   : > { %576 = vmatprep.subr.mxu1 %v320_v18 }
  0x2a   : > { %577 = vmatpush3.msra.mxu1 %v320_v18 }
  0x2b   : > { %578 = vmatprep.subr.mxu1 %v319_v19 }
  0x2c   : > { %579 = vmatpush3.msra.mxu1 %v319_v19 }
  0xd4   : > { %v297_v22 = vpop.f32.mrf.mxu0 }
  0xd5   : > { %v306_v24 = vadd.f32 %v512_v21, %v297_v22 }
  0xd6   : > { %v546_v26 = vpop.f32.mrf.mxu0 }
  0xd7   : > { %v315_v27 = vadd.f32 %v502_v23, %v306_v24 }
  0xd8   : > { %v300_v28 = vpop.f32.mrf.mxu0 }
  0xd9   : > { %v307_v29 = vadd.f32 %v513_v25, %v300_v28  ;;  %v317_v30 = vmax.f32 %v315_v27, 0.0 }
  0xda   : > { %v547_v31 = vpop.f32.mrf.mxu0 }
  0xdb   : > { %v316_v32 = vadd.f32 %v502_v23, %v307_v29  ;;  %580 = vmatprep.mubr.f32.mxu1 %v317_v30 }
  0xdd   : > { %v318_v33 = vmax.f32 %v316_v32, 0.0 }
  0xdf   : > { %581 = vmatmul.mubr.f32.vlgmr.msra.gmra.mxu1 %v318_v33 }
 0x19f   : > { %v582_v35 = vpop.f32.mrf.mxu1 }
 0x1a0   : > { %v414_v36 = vadd.f32 %v582_v35, %v503_v34 }
 0x1a1   : > { %v408_v37 = vpop.f32.mrf.mxu1 }
 0x1a2   : > { %v409_v38 = vadd.f32 %v503_v34, %v408_v37  ;;  %v418_v39 = vmax.f32 %v414_v36, 0.0 }
 0x1a4   : > { %v417_v40 = vmax.f32 %v409_v38, 0.0 }
 0x1a6   : > { %v517_v41 = vpack.c.bf16 %v418_v39, %v417_v40 }
 0x1a8   : > { %518 = vst [vmem:[%s226_s29] sm:$0xff] %v517_v41  }
 0x1a9 PF: > { %s15_s18 = sadd.s32 1, %s602_s18  }
 0x1aa   : > { %p12_p4 = scmp.ge.s32.totalorder %s15_s18, 4  }
 0x1ac   :  { %14 = sbr.rel (!%p12_p4) target bundleno = 1 (0x1), region = 71 }

// kernel: gin_net_cora_forward.5
= control target key start
LH: loop header
LB: loop body
LE: loop exit
PB: predicated region body
PF: predicated region fallthrough
CT: control target
= control target key end

     0   :  { %11 = vsyncpa [#allocation3], 0  ;;  %s1149_s0 = inlined_call_operand.vmem [shape: bf16[32,32], index: 0, kind: input, shape index: {}]   ;;  %s1150_s1 = inlined_call_operand.vmem [shape: bf16[32,128], index: 1, kind: input, shape index: {}]   ;;  %s1151_s2 = inlined_call_operand.vmem [shape: f32[128,128], index: 2, kind: input, shape index: {}]   ;;  %s1152_s3 = inlined_call_operand.vmem [shape: f32[1,128], index: 3, kind: input, shape index: {}]   ;;  %s1153_s4 = inlined_call_operand.vmem [shape: f32[128,128], index: 4, kind: input, shape index: {}]   ;;  %s1154_s5 = inlined_call_operand.vmem [shape: f32[1,128], index: 5, kind: input, shape index: {}]   ;;  %s1155_s6 = inlined_call_operand.hbm [shape: f32[32,128], index: 6, kind: output, shape index: {}]  }
   0x1   :  { %13 = vsyncpa [#allocation3 + $0x1], 0  ;;  %s936_s21 = smov 0   ;;  %s938_s22 = smov 0  }
   0x2   :  { %s940_s23 = smov 0   ;;  %s942_s24 = smov 0  }
   0x3 LB: > { %s957_s25 = sadd.s32 4294967295, %s894_s24   ;;  %s638_s26 = sadd.s32 4294967294, %s894_s24   ;;  %s894_s24 = sphi %s942_s24, %s1161_s24   ;;  %s890_s23 = sphi %s940_s23, %s1160_s23   ;;  %s886_s22 = sphi %s938_s22, %s1159_s22   ;;  %s882_s21 = sphi %s936_s21, %s1158_s21  }
   0x4   : > { %s961_s27 = sadd.s32 1, %s894_s24   ;;  %s157_s28 = sadd.s32 1, %s890_s23 }
   0x5   : > { %s154_s29 = ssub.s32 %s894_s24, %s961_s27  ;;  %p167_p0 = scmp.ne.s32.totalorder %s890_s23, %s886_s22 }
   0x6   : > { %p155_p1 = scmp.eq.s32.totalorder %s154_s29, 0  ;;  %p168_p2 = scmp.eq.s32.totalorder %s957_s25, 1 }
   0x7   : > { %p173_p3 = scmp.ne.s32.totalorder %s886_s22, %s882_s21  ;;  %p174_p4 = scmp.eq.s32.totalorder %s638_s26, 1 }
   0x8   : > { %s972_s30 = scalar_select %p155_p1, %s890_s23, %s157_s28  }
   0x9   : > { %p974_p5 = por %p168_p2, %p167_p0  ;;  %p978_p6 = por %p174_p4, %p173_p3 }
   0xa   : > { %p641_p7 = scmp.ge.s32.totalorder %s894_s24, 1  ;;  %p216_p8 = scmp.lt.s32.totalorder %s894_s24, 3 }
   0xc   : > { %p217_p9 = pnand %p641_p7, %p216_p8 }
   0xd   : > { %s643_s13 = sshll.u32 (!%p217_p9), %s957_s25, 1  ;;  %s645_s15 = sshll.u32 (!%p217_p9), %s957_s25, 4 }
   0xe   : > { %220 = sbr.rel (%p217_p9) target bundleno = 955 (0x3bb), region = 44  ;;  %p247_p10 = scmp.lt.s32.totalorder (!%p217_p9), %s643_s13, 3 }
   0xf   : > { %s243_s17 = sand.u32 (!%p217_p9), 1, %s886_s22   ;;  %s898_s11 = smov (!%p217_p9), [#allocation2]  }
  0x10   : > { %s642_s18 = sshll.u32 (!%p217_p9), %s243_s17, 4  ;;  %s838_s12 = sshll.u32 (!%p217_p9), %s898_s11, 4  ;;  %s839_s12 = int_to_ptr.vmem [resolvable:$false] %s838_s12 }
  0x11   : > { %s245_s20 = scalar_lea.vmem (!%p217_p9), [#allocation2], %s642_s18  ;;  %s840_s14 = scalar_lea.vmem (!%p217_p9), %s839_s12, 512 }
  0x12   : > { %s574_s26 = sshll.u32 (!%p217_p9), %s245_s20, 4  ;;  %s1107_s26 = int_to_ptr.vmem [resolvable:$true] %s574_s26 }
  0x13   : > { %v823_v0 = vld [vmem:[%s1150_s1 + $0x8] sm:$0xff]   ;;  %v896_v1 = vmov 0.0   ;;  %v824_v2 = vld [vmem:[%s1150_s1] sm:$0xff]   ;;  %vm897_vm0 = vmmov 0   ;;  %v348_v3 = vld [vmem:[%s1151_s2 + $0x78] sm:$0xff]  ;;  %s1163_s13 = smov (!%p247_p10, %s643_s13), 3  ;;  %v531_v52 = vlaneseq  ;;  %p841_p0 = scmp.lt.s32.totalorder %s1107_s26, %s839_s12 }
  0x14   : > { %702 = vmatprep.subr.bf16.mxu0 %v896_v1  ;;  %706 = vmatprep.mubr.msk.bf16.mxu0 %vm897_vm0, %v896_v1  ;;  %v347_v4 = vld [vmem:[%s1151_s2 + $0x70] sm:$0xff]  ;;  %v346_v5 = vld [vmem:[%s1151_s2 + $0x68] sm:$0xff]  ;;  %v345_v6 = vld [vmem:[%s1151_s2 + $0x60] sm:$0xff]  ;;  %s644_s28 = sshll.u32 %s1163_s13, 2  ;;  %vm284_vm1 = vcmask 261120   ;;  %s255_s13 = sshra.s32 %s645_s15, 3 }
  0x15   : > { %703 = vmatpush3.bf16.msra.mxu0 %v823_v0  ;;  %710 = vmatprep.subr.mxu1 %v348_v3  ;;  %s250_s10 = scalar_lea.vmem %s1149_s0, %s644_s28  ;;  %v344_v7 = vld [vmem:[%s1151_s2 + $0x58] sm:$0xff]  ;;  %v343_v9 = vld [vmem:[%s1151_s2 + $0x50] sm:$0xff]  ;;  %v342_v10 = vld [vmem:[%s1151_s2 + $0x48] sm:$0xff]  ;;  %s646_s16 = sshll.u32 %s255_s13, 2  ;;  %v532_v54 = vand.u32 127, %v531_v52 }
  0x16   : > { %704 = vmatprep.subr.bf16.mxu0 %v896_v1  ;;  %711 = vmatpush3.msra.mxu1 %v348_v3  ;;  %v825_v8 = vld [vmem:[%s250_s10] sm:$0xff]   ;;  %v340_v12 = vld [vmem:[%s1151_s2 + $0x38] sm:$0xff]  ;;  %v339_v13 = vld [vmem:[%s1151_s2 + $0x30] sm:$0xff]  ;;  %s258_s19 = scalar_lea.vmem %s1150_s1, %s646_s16  ;;  %s1109_s10 = scalar_lea.sflag [#allocation3], %s243_s17 }
  0x17   : > { %712 = vmatprep.subr.mxu1 %v347_v4  ;;  %v341_v11 = vld [vmem:[%s1151_s2 + $0x40] sm:$0xff]  ;;  %v338_v14 = vld [vmem:[%s1151_s2 + $0x28] sm:$0xff]  ;;  %v336_v16 = vld [vmem:[%s1151_s2 + $0x18] sm:$0xff]  ;;  %vm533_vm2 = vcmp.lt.s32.totalorder %v532_v54, 8 }
  0x18   : > { %713 = vmatpush3.msra.mxu1 %v347_v4  ;;  %v337_v15 = vld [vmem:[%s1151_s2 + $0x20] sm:$0xff]  ;;  %v335_v17 = vld [vmem:[%s1151_s2 + $0x10] sm:$0xff]  ;;  %v334_v18 = vld [vmem:[%s1151_s2 + $0x8] sm:$0xff] }
  0x19   : > { %705 = vmatpush3.bf16.msra.mxu0 %v824_v2  ;;  %714 = vmatprep.subr.mxu1 %v346_v5  ;;  %v333_v19 = vld [vmem:[%s1151_s2] sm:$0xff]  ;;  %v448_v20 = vld [vmem:[%s1153_s4 + $0x78] sm:$0xff]  ;;  %v447_v21 = vld [vmem:[%s1153_s4 + $0x70] sm:$0xff] }
  0x1a   : > { %715 = vmatpush3.msra.mxu1 %v346_v5  ;;  %745 = vmatprep.subr.mxu0 %v448_v20  ;;  %v446_v22 = vld [vmem:[%s1153_s4 + $0x68] sm:$0xff]  ;;  %v445_v23 = vld [vmem:[%s1153_s4 + $0x60] sm:$0xff]  ;;  %v444_v24 = vld [vmem:[%s1153_s4 + $0x58] sm:$0xff] }
  0x1b   : > { %716 = vmatprep.subr.mxu1 %v345_v6  ;;  %v443_v25 = vld [vmem:[%s1153_s4 + $0x50] sm:$0xff]  ;;  %v442_v26 = vld [vmem:[%s1153_s4 + $0x48] sm:$0xff]  ;;  %v441_v27 = vld [vmem:[%s1153_s4 + $0x40] sm:$0xff] }
  0x1c   : > { %717 = vmatpush3.msra.mxu1 %v345_v6  ;;  %707 = vmatmul.mubr.msk.bf16.vlgmr.msra.gmra.mxu0 %vm284_vm1, %v825_v8  ;;  %v440_v28 = vld [vmem:[%s1153_s4 + $0x38] sm:$0xff]  ;;  %v439_v29 = vld [vmem:[%s1153_s4 + $0x30] sm:$0xff]  ;;  %v438_v30 = vld [vmem:[%s1153_s4 + $0x28] sm:$0xff] }
  0x1d   : > { %718 = vmatprep.subr.mxu1 %v344_v7  ;;  %746 = vmatpush3.msra.mxu0 %v448_v20  ;;  %v437_v31 = vld [vmem:[%s1153_s4 + $0x20] sm:$0xff]  ;;  %v436_v41 = vld [vmem:[%s1153_s4 + $0x18] sm:$0xff]  ;;  %v435_v42 = vld [vmem:[%s1153_s4 + $0x10] sm:$0xff] }
  0x1e   : > { %719 = vmatpush3.msra.mxu1 %v344_v7  ;;  %747 = vmatprep.subr.mxu0 %v447_v21  ;;  %v660_v32 = vld [vmem:[%s258_s19] sm:$0xff]   ;;  %v434_v43 = vld [vmem:[%s1153_s4 + $0x8] sm:$0xff]  ;;  %s658_s19 = sshll.u32 %s957_s25, 8  ;;  %s834_s25 = scalar_lea.vmem %s1107_s26, 256 }
  0x1f   : > { %720 = vmatprep.subr.mxu1 %v343_v9  ;;  %748 = vmatpush3.msra.mxu0 %v447_v21  ;;  %v661_v33 = vunpack.c.l.bf16 %v660_v32  ;;  %v662_v36 = vunpack.c.h.bf16 %v660_v32  ;;  %v433_v44 = vld [vmem:[%s1153_s4] sm:$0xff]  ;;  %s1105_s9 = scalar_lea.hbm %s1155_s6, %s658_s19  ;;  %p835_p11 = scmp.ne.s32.totalorder %s1107_s26, %s834_s25 }
  0x20   : > { %721 = vmatpush3.msra.mxu1 %v343_v9  ;;  %749 = vmatprep.subr.mxu0 %v446_v22  ;;  %v651_v45 = vld [vmem:[%s1152_s3] ss:$0 sm:$0xff]  ;;  %p842_p1 = scmp.lt.s32.totalorder %s840_s14, %s834_s25 }
  0x21   : > { %722 = vmatprep.subr.mxu1 %v342_v10  ;;  %750 = vmatpush3.msra.mxu0 %v446_v22  ;;  %v652_v55 = vld [vmem:[%s1154_s5] ss:$0 sm:$0xff]  ;;  %p836_p12 = pnand %p835_p11, %p974_p5 }
  0x22   : > { %723 = vmatpush3.msra.mxu1 %v342_v10  ;;  %751 = vmatprep.subr.mxu0 %v445_v23  ;;  %p843_p2 = por %p842_p1, %p841_p0 }
  0x23   : > { %724 = vmatprep.subr.mxu1 %v341_v11  ;;  %752 = vmatpush3.msra.mxu0 %v445_v23  ;;  %p837_p13 = pneg %p836_p12 }
  0x24   : > { %725 = vmatpush3.msra.mxu1 %v341_v11  ;;  %753 = vmatprep.subr.mxu0 %v444_v24 }
  0x25   : > { %726 = vmatprep.subr.mxu1 %v340_v12  ;;  %754 = vmatpush3.msra.mxu0 %v444_v24  ;;  %p844_p3 = pnand %p843_p2, %p837_p13 }
  0x26   : > { %727 = vmatpush3.msra.mxu1 %v340_v12  ;;  %755 = vmatprep.subr.mxu0 %v443_v25 }
  0x27   : > { %728 = vmatprep.subr.mxu1 %v339_v13  ;;  %756 = vmatpush3.msra.mxu0 %v443_v25 }
  0x28   : > { %729 = vmatpush3.msra.mxu1 %v339_v13  ;;  %757 = vmatprep.subr.mxu0 %v442_v26 }
  0x29   : > { %730 = vmatprep.subr.mxu1 %v338_v14  ;;  %758 = vmatpush3.msra.mxu0 %v442_v26 }
  0x2a   : > { %731 = vmatpush3.msra.mxu1 %v338_v14  ;;  %759 = vmatprep.subr.mxu0 %v441_v27 }
  0x2b   : > { %732 = vmatprep.subr.mxu1 %v337_v15  ;;  %760 = vmatpush3.msra.mxu0 %v441_v27 }
  0x2c   : > { %733 = vmatpush3.msra.mxu1 %v337_v15  ;;  %761 = vmatprep.subr.mxu0 %v440_v28 }
  0x2d   : > { %734 = vmatprep.subr.mxu1 %v336_v16  ;;  %762 = vmatpush3.msra.mxu0 %v440_v28 }
  0x2e   : > { %735 = vmatpush3.msra.mxu1 %v336_v16  ;;  %763 = vmatprep.subr.mxu0 %v439_v29 }
  0x2f   : > { %736 = vmatprep.subr.mxu1 %v335_v17  ;;  %764 = vmatpush3.msra.mxu0 %v439_v29 }
  0x30   : > { %737 = vmatpush3.msra.mxu1 %v335_v17  ;;  %765 = vmatprep.subr.mxu0 %v438_v30 }
  0x31   : > { %738 = vmatprep.subr.mxu1 %v334_v18  ;;  %766 = vmatpush3.msra.mxu0 %v438_v30 }
  0x32   : > { %739 = vmatpush3.msra.mxu1 %v334_v18  ;;  %767 = vmatprep.subr.mxu0 %v437_v31 }
  0x33   : > { %740 = vmatprep.subr.mxu1 %v333_v19  ;;  %768 = vmatpush3.msra.mxu0 %v437_v31 }
  0x34   : > { %741 = vmatpush3.msra.mxu1 %v333_v19  ;;  %769 = vmatprep.subr.mxu0 %v436_v41 }
  0x35   : > { %770 = vmatpush3.msra.mxu0 %v436_v41 }
  0x36   : > { %771 = vmatprep.subr.mxu0 %v435_v42 }
  0x37   : > { %772 = vmatpush3.msra.mxu0 %v435_v42 }
  0x38   : > { %773 = vmatprep.subr.mxu0 %v434_v43 }
  0x39   : > { %774 = vmatpush3.msra.mxu0 %v434_v43 }
  0x3a   : > { %775 = vmatprep.subr.mxu0 %v433_v44 }
  0x3b   : > { %776 = vmatpush3.msra.mxu0 %v433_v44 }
  0xdc   : > { %v322_v34 = vpop.f32.mrf.mxu0 }
  0xdd   : > { %v331_v35 = vadd.f32 %v661_v33, %v322_v34 }
  0xde   : > { %v708_v37 = vpop.f32.mrf.mxu0 }
  0xdf   : > { %742 = vmatprep.mubr.f32.mxu1 %v331_v35 }
  0xe0   : > { %v325_v38 = vpop.f32.mrf.mxu0 }
  0xe1   : > { %v332_v39 = vadd.f32 %v662_v36, %v325_v38 }
  0xe2   : > { %v709_v40 = vpop.f32.mrf.mxu0 }
  0xe3   : > { %743 = vmatmul.mubr.f32.vlgmr.msra.gmra.mxu1 %v332_v39 }
 0x1a3   : > { %v744_v46 = vpop.f32.mrf.mxu1 }
 0x1a4   : > { %v428_v47 = vadd.f32 %v744_v46, %v651_v45 }
 0x1a5   : > { %v422_v48 = vpop.f32.mrf.mxu1 }
 0x1a6   : > { %v423_v49 = vadd.f32 %v651_v45, %v422_v48  ;;  %v432_v51 = vmax.f32 %v428_v47, 0.0 }
 0x1a8   : > { %v431_v50 = vmax.f32 %v423_v49, 0.0 }
 0x1aa   : > { %777 = vmatprep.mubr.f32.mxu0 %v431_v50 }
 0x1ab   : > { %778 = vmatmul.mubr.f32.vlgmr.msra.gmra.mxu0 %v432_v51 }
 0x26b   : > { %v779_v53 = vpop.f32.mrf.mxu0 }
 0x26c   : > { %v528_v58 = vadd.f32 %v779_v53, %v652_v55 }
 0x26d   : > { %v522_v56 = vpop.f32.mrf.mxu0 }
 0x26e   : > { %v523_v57 = vadd.f32 %v652_v55, %v522_v56  ;;  %v537_v60 = vsel %vm533_vm2, %v528_v58, -1e+30 }
 0x270   : > { %v536_v59 = vsel %vm533_vm2, %v523_v57, -1e+30 }
 0x271   : > { %538 = vmax.xlane.f32.xlu0 %v536_v59 }
 0x275   : > { %540 = vmax.xlane.f32.xlu0 %v537_v60 }
 0x2fa   : > { %v539_v61 = vpop.xlane.xlu0 %538 }
 0x2fb   : > { %v542_v62 = vsub.f32 %v536_v59, %v539_v61 }
 0x2fd   : > { %v544_v63 = vmul.f32 1.442695, %v542_v62 }
 0x2fe   : > { %v541_v0 = vpop.xlane.xlu0 %540 }
 0x2ff   : > { %v543_v1 = vsub.f32 %v537_v60, %v541_v0  ;;  %826 = vpow2.f32 %v544_v63 }
 0x301   : > { %v546_v2 = vmul.f32 1.442695, %v543_v1 }
 0x303   : > { %828 = vpow2.f32 %v546_v2 }
 0x30c   : > { %v827_v3 = vpop.eup %826 }
 0x30d   : > { %548 = vadd.xlane.f32.xlu1 %v827_v3 }
 0x310   : > { %v829_v4 = vpop.eup %828 }
 0x311   : > { %550 = vadd.xlane.f32.xlu1 %v829_v4 }
 0x396   : > { %v549_v5 = vpop.xlane.xlu1 %548 }
 0x397   : > { %830 = vlog2.f32 %v549_v5 }
 0x39a   : > { %v551_v6 = vpop.xlane.xlu1 %550 }
 0x39b   : > { %832 = vlog2.f32 %v551_v6 }
 0x3a4   : > { %v831_v7 = vpop.eup %830 }
 0x3a5   : > { %v553_v8 = vmul.f32 0.6931472, %v831_v7 }
 0x3a7   : > { %v556_v9 = vsub.f32 %v542_v62, %v553_v8 }
 0x3a8   : > { %v833_v10 = vpop.eup %832 }
 0x3a9   : > { %558 = vst [vmem:[%s245_s20] sm:$0xff] %v556_v9  ;;  %v555_v11 = vmul.f32 0.6931472, %v833_v10 }
 0x3ab   : > { %v557_v12 = vsub.f32 %v543_v1, %v555_v11 }
 0x3ad   : > { %559 = vst [vmem:[%s245_s20 + $0x8] sm:$0xff] %v557_v12 }
 0x3ae   : > { %847 = shalt.err (!%p844_p3)
}
 0x3af   : > { %s848_s15 = scalar_lea.hbm %s1105_s9, 256  ;;  %s852_s17 = scalar_lea.hbm %s1155_s6, 512 }
 0x3b0   : > { %p849_p4 = scmp.ne.s32.totalorder %s1105_s9, %s848_s15  ;;  %p853_p9 = scmp.lt.s32.totalorder %s1105_s9, %s1155_s6 }
 0x3b1   : > { %p854_p10 = scmp.lt.s32.totalorder %s852_s17, %s848_s15 }
 0x3b2   : > { %p850_p7 = pnand %p849_p4, %p974_p5 }
 0x3b3   : > { %p855_p11 = por %p854_p10, %p853_p9 }
 0x3b4   : > { %p851_p8 = pneg %p850_p7 }
 0x3b6   : > { %p856_p12 = pnand %p855_p11, %p851_p8 }
 0x3b8   : > { %859 = shalt.err (!%p856_p12)
}
 0x3b9   : > { %s899_s20 = smov 128   ;;  %s900_s28 = smov 8  }
 0x3ba   : > { %780 = dma.vmem_to_hbm [thread:$0]  (%p974_p5), %s1107_s26, 256, %s1105_s9, %s1109_s10, %s899_s20, %s899_s20, %s900_s28  }
 0x3bb PF: > { %p786_p13 = scmp.ge.s32.totalorder %s894_s24, 2  ;;  %s589_s29 = sand.u32 1, %s882_s21  }
 0x3bc   : > { %s590_s25 = scalar_lea.sflag [#allocation3], %s589_s29 }
 0x3bd   : > { %p783_p0 = pnand %p786_p13, %p978_p6 }
 0x3bf   : > { %p784_p1 = pneg %p783_p0 }
 0x3c1   : > { %877 = dma.done.wait (%p784_p1), %s590_s25, 256  }
 0x3c2   : > { %879 = vsyncadd (%p784_p1), %s590_s25, 4294967040  ;;  %p16_p2 = scmp.ge.s32.totalorder %s961_s27, 4   ;;  %s1158_s21 = smov %s886_s22 }
 0x3c3   : > { %s1159_s22 = smov %s890_s23  ;;  %s1160_s23 = smov %s972_s30 }
 0x3c4   : > { %s1161_s24 = smov %s961_s27  ;;  %18 = sbr.rel (!%p16_p2) target bundleno = 3 (0x3), region = 80 }
 0x3c9   :  { %595 = vsyncpa [#allocation3], 1 }
 0x3ca   :  { %597 = vsyncpa [#allocation3 + $0x1], 1 }

</bundles_post_ra>
